<compile_context>
chip_gen: v6e
topology: v6e:2x2x1
jax: 0.10.0
libtpu: 0.0.40
codegen_flags: <defaults>
</compile_context>

<pallas_src>
import functools

import jax
import jax.numpy as jnp
from jax import lax
from jax.experimental import pallas as pl
from jax.experimental.pallas import tpu as pltpu

BIT = 64.0
TEMP = 0.3
_SCALE = 1.0 / (BIT * TEMP)


def _round_up(x, m):
    return ((x + m - 1) // m) * m


def _lse_kernel(h1_ref, h2_ref, lse_ref, m_sc, l_sc, *, tm, m_valid, needs_mask):
    """Grid: (N-tiles, M-tiles). M is the streaming log-sum-exp reduction axis.

    h1_ref already carries the 1/(bit*temp) scale (folded in by the wrapper).
    The kernel emits per-row LSE only; the CE numerator is handled outside.
    """
    j = pl.program_id(1)
    nm = pl.num_programs(1)

    @pl.when(j == 0)
    def _init():
        m_sc[...] = jnp.full(m_sc.shape, -jnp.inf, dtype=jnp.float32)
        l_sc[...] = jnp.zeros(l_sc.shape, dtype=jnp.float32)

    # Logits tile: NT contraction over the shared feature (lane) axis -> MXU,
    # f32 accumulation. No per-tile elementwise scale pass.
    s = lax.dot_general(
        h1_ref[...], h2_ref[...],
        dimension_numbers=(((1,), (1,)), ((), ())),
        preferred_element_type=jnp.float32,
    )  # [tn, tm] f32

    def _update(s_tile):
        m_prev = m_sc[...]
        m_new = jnp.maximum(m_prev, jnp.max(s_tile, axis=-1, keepdims=True))
        alpha = jnp.exp(m_prev - m_new)  # == 0 on the very first tile
        l_sc[...] = alpha * l_sc[...] + jnp.sum(
            jnp.exp(s_tile - m_new), axis=-1, keepdims=True)
        m_sc[...] = m_new

    if needs_mask:
        # Only the last M tile contains padded candidate columns; interior
        # tiles take the unmasked fast path (no compare/select pass).
        @pl.when(j < nm - 1)
        def _interior():
            _update(s)

        @pl.when(j == nm - 1)
        def _last():
            col = j * tm + lax.broadcasted_iota(jnp.int32, s.shape, 1)
            _update(jnp.where(col < m_valid, s, -jnp.inf))
    else:
        _update(s)

    # Finalize per-row log-sum-exp on the last M tile.
    @pl.when(j == nm - 1)
    def _finalize():
        lse_ref[...] = m_sc[...] + jnp.log(l_sc[...])


def _vmem_bytes(tn, tm, k_pad, itemsize):
    # double-buffered input tiles + f32 logits temp + tiny scratch/output
    return 2 * (tn + tm) * k_pad * itemsize + tn * tm * 4 + 8 * tn * 4


def cl_loss(h1, h2, weighted, *, tn=512, tm=1024,
            max_resident_bytes=28 * 1024 * 1024,
            vmem_budget_bytes=40 * 1024 * 1024,
            use_bf16_matmul=False):
    """h1: [N, K], h2: [M, K] (float), weighted: [N] int class ids in [0, M)."""
    n, k = h1.shape
    m, k2 = h2.shape
    assert k == k2, (k, k2)

    # ---- CE numerator: target logits, O(N*K), once, outside the M loop.
    h2_rows = jnp.take(h2, weighted.astype(jnp.int32), axis=0)            # [N, K]
    tgt_logit = jnp.sum(h1.astype(jnp.float32) * h2_rows.astype(jnp.float32),
                        axis=-1) * _SCALE                                 # [N] f32

    # ---- fold the 1/(bit*temp) scale into h1 once, in f32, before any cast.
    compute_dtype = jnp.bfloat16 if use_bf16_matmul else h1.dtype
    h1s = (h1.astype(jnp.float32) * _SCALE).astype(compute_dtype)
    h2c = h2.astype(compute_dtype)
    itemsize = jnp.dtype(compute_dtype).itemsize

    # ---- feature (lane) axis: pad to a 128 multiple only if misaligned.
    k_pad = _round_up(k, 128) if (k % 128) else k

    # ---- row (N) tiling: >= 2 blocks for mid/large N (v7x has 2 TCs).
    if n <= 256:
        tn_eff = min(_round_up(n, 8), max(8, _round_up(tn, 8)))
    else:
        tn_eff = max(8, min(_round_up(tn, 8), _round_up(pl.cdiv(n, 2), 8)))
    n_pad = _round_up(n, tn_eff)

    # ---- candidate (M) tiling: resident single tile when it fits VMEM,
    #      otherwise streaming LSE with budget-fitted tiles.
    tm_full = _round_up(m, 8)
    if _vmem_bytes(tn_eff, tm_full, k_pad, itemsize) <= max_resident_bytes:
        tm_eff = tm_full          # one M tile: h2 read from HBM exactly once
    else:
        tm_eff = _round_up(min(max(8, tm), tm_full), 8)
        while (_vmem_bytes(tn_eff, tm_eff, k_pad, itemsize) > vmem_budget_bytes
               and tm_eff > 256):
            tm_eff = _round_up(tm_eff // 2, 8)
        while (_vmem_bytes(tn_eff, tm_eff, k_pad, itemsize) > vmem_budget_bytes
               and tn_eff > 64):
            tn_eff = _round_up(tn_eff // 2, 8)
            n_pad = _round_up(n, tn_eff)
        # TODO(synk): for very large K an inner K-tiling loop would be needed to
        # stay under v7x's 64 MiB/TC VMEM; not implemented here.
    m_pad = _round_up(m, tm_eff)
    needs_mask = (m_pad != m)

    # ---- statically-guarded padding (no extra HBM pass in the aligned case).
    if n_pad != n or k_pad != k:
        h1s = jnp.pad(h1s, ((0, n_pad - n), (0, k_pad - k)))
    if m_pad != m or k_pad != k:
        h2c = jnp.pad(h2c, ((0, m_pad - m), (0, k_pad - k)))

    grid = (n_pad // tn_eff, m_pad // tm_eff)
    kernel = functools.partial(_lse_kernel, tm=tm_eff, m_valid=m,
                               needs_mask=needs_mask)

    est = _vmem_bytes(tn_eff, tm_eff, k_pad, itemsize)
    vmem_limit = int(min(max(est + (4 << 20), 16 << 20), 48 << 20))

    lse = pl.pallas_call(
        kernel,
        out_shape=jax.ShapeDtypeStruct((n_pad, 1), jnp.float32),
        grid_spec=pltpu.PrefetchScalarGridSpec(
            num_scalar_prefetch=0,
            grid=grid,
            in_specs=[
                pl.BlockSpec((tn_eff, k_pad), lambda i, j: (i, 0)),  # scaled h1 rows
                pl.BlockSpec((tm_eff, k_pad), lambda i, j: (j, 0)),  # h2 candidates
            ],
            out_specs=pl.BlockSpec((tn_eff, 1), lambda i, j: (i, 0)),
            scratch_shapes=[
                pltpu.VMEM((tn_eff, 1), jnp.float32),   # running max  m_i
                pltpu.VMEM((tn_eff, 1), jnp.float32),   # running sum  l_i
            ],
        ),
        compiler_params=pltpu.CompilerParams(
            dimension_semantics=("parallel", "arbitrary"),
            vmem_limit_bytes=vmem_limit,
        ),
    )(h1s, h2c)

    # Tiny O(N) epilogue: loss_i = lse_i - logits[i, y_i]; mean over real rows.
    return jnp.mean(lse[:n, 0] - tgt_logit)


def _reference(h1, h2, weighted):
    logits = jnp.einsum("ik,jk->ij", h1, h2) / BIT / TEMP
    logp = jax.nn.log_softmax(logits, axis=-1)
    return -jnp.mean(jnp.take_along_axis(logp, weighted[:, None], axis=-1))


if __name__ == "__main__":
    key = jax.random.PRNGKey(0)
    k1, k2, k3 = jax.random.split(key, 3)

    # Small shapes consistent with the module: N samples, M candidates, K dims.
    N, M, K = 16, 24, 48
    h1 = jax.random.normal(k1, (N, K), dtype=jnp.float32)
    h2 = jax.random.normal(k2, (M, K), dtype=jnp.float32)
    weighted = jax.random.randint(k3, (N,), 0, M, dtype=jnp.int32)

    ref = jax.block_until_ready(_reference(h1, h2, weighted))

    # 1) resident path: whole h2 lives in VMEM, single M tile per row block.
    loss_resident = jax.block_until_ready(cl_loss(h1, h2, weighted))
    # 2) streaming path: multiple N blocks, multiple M tiles, masked last tile.
    loss_streamed = jax.block_until_ready(
        cl_loss(h1, h2, weighted, tn=8, tm=16, max_resident_bytes=0))

    assert jnp.allclose(loss_resident, ref, rtol=1e-4, atol=1e-5), (loss_resident, ref)
    assert jnp.allclose(loss_streamed, ref, rtol=1e-4, atol=1e-5), (loss_streamed, ref)
    print("KERNEL_OK")
</pallas_src>

<mosaic_0001>
module attributes {stable_mosaic.version = 11 : i64} {
  func.func @_lse_kernel(%arg0: i32, %arg1: i32, %arg2: memref<16x128xf32, #tpu.memory_space<vmem>>, %arg3: memref<24x128xf32, #tpu.memory_space<vmem>>, %arg4: memref<16x1xf32, #tpu.memory_space<vmem>>, %arg5: memref<16x1xf32, #tpu.memory_space<vmem>>, %arg6: memref<16x1xf32, #tpu.memory_space<vmem>>) attributes {dimension_semantics = [#tpu.dimension_semantics<parallel>, #tpu.dimension_semantics<arbitrary>], iteration_bounds = array<i64: 1, 1>, scalar_prefetch = 0 : i64, scratch_operands = 2 : i64, tpu.core_type = #tpu.core_type<tc>, window_params = [{transform_indices = @transform_0, window_bounds = array<i64: 16, 128>}, {transform_indices = @transform_1, window_bounds = array<i64: 24, 128>}, {transform_indices = @transform_2, window_bounds = array<i64: 16, 1>}]} {
    %c0_i32 = arith.constant 0 : i32
    %0 = arith.cmpi eq, %arg1, %c0_i32 : i32
    %1 = arith.extui %0 : i1 to i32
    %c0_i32_0 = arith.constant 0 : i32
    %2 = arith.cmpi ne, %1, %c0_i32_0 : i32
    scf.if %2 {
      %cst_16 = arith.constant 0xFF800000 : f32
      %25 = vector.broadcast %cst_16 : f32 to vector<16x1xf32>
      %c0_17 = arith.constant 0 : index
      %c0_18 = arith.constant 0 : index
      %26 = vector.load %arg5[%c0_17, %c0_18] : memref<16x1xf32, #tpu.memory_space<vmem>>, vector<16x1xf32>
      tpu.vector_store %arg5[%c0_17, %c0_18], %25 {strides = array<i32>} : memref<16x1xf32, #tpu.memory_space<vmem>>, vector<16x1xf32>,
      %cst_19 = arith.constant 0.000000e+00 : f32
      %27 = vector.broadcast %cst_19 : f32 to vector<16x1xf32>
      %c0_20 = arith.constant 0 : index
      %c0_21 = arith.constant 0 : index
      %28 = vector.load %arg6[%c0_20, %c0_21] : memref<16x1xf32, #tpu.memory_space<vmem>>, vector<16x1xf32>
      tpu.vector_store %arg6[%c0_20, %c0_21], %27 {strides = array<i32>} : memref<16x1xf32, #tpu.memory_space<vmem>>, vector<16x1xf32>,
    } else {
    }
    %c0 = arith.constant 0 : index
    %c0_1 = arith.constant 0 : index
    %3 = vector.load %arg2[%c0, %c0_1] : memref<16x128xf32, #tpu.memory_space<vmem>>, vector<16x128xf32>
    %c0_2 = arith.constant 0 : index
    %c0_3 = arith.constant 0 : index
    %4 = vector.load %arg3[%c0_2, %c0_3] : memref<24x128xf32, #tpu.memory_space<vmem>>, vector<24x128xf32>
    %cst = arith.constant dense<0.000000e+00> : vector<16x24xf32>
    %5 = tpu.matmul %3, %4, %cst {dimension_numbers = #tpu.dot_dimension_numbers<[1], [1], [0], [0], [0, 0, 1, 0], [], []>} : vector<16x128xf32>, vector<24x128xf32>, vector<16x24xf32> -> vector<16x24xf32>
    %c0_4 = arith.constant 0 : index
    %c0_5 = arith.constant 0 : index
    %6 = vector.load %arg5[%c0_4, %c0_5] : memref<16x1xf32, #tpu.memory_space<vmem>>, vector<16x1xf32>
    %cst_6 = arith.constant dense<0xFF800000> : vector<16xf32>
    %7 = vector.multi_reduction <maximumf>, %5, %cst_6 [1] : vector<16x24xf32> to vector<16xf32>
    %8 = vector.shape_cast %7 : vector<16xf32> to vector<16x1xf32>
    %9 = arith.maximumf %6, %8 : vector<16x1xf32>
    %10 = arith.subf %6, %9 : vector<16x1xf32>
    %11 = math.exp %10 : vector<16x1xf32>
    %c0_7 = arith.constant 0 : index
    %c0_8 = arith.constant 0 : index
    %12 = vector.load %arg6[%c0_7, %c0_8] : memref<16x1xf32, #tpu.memory_space<vmem>>, vector<16x1xf32>
    %13 = arith.mulf %11, %12 : vector<16x1xf32>
    %14 = vector.broadcast %9 : vector<16x1xf32> to vector<16x24xf32>
    %15 = arith.subf %5, %14 : vector<16x24xf32>
    %16 = math.exp %15 : vector<16x24xf32>
    %cst_9 = arith.constant dense<0.000000e+00> : vector<16xf32>
    %17 = vector.multi_reduction <add>, %16, %cst_9 [1] : vector<16x24xf32> to vector<16xf32>
    %18 = vector.shape_cast %17 : vector<16xf32> to vector<16x1xf32>
    %19 = arith.addf %13, %18 : vector<16x1xf32>
    %c0_10 = arith.constant 0 : index
    %c0_11 = arith.constant 0 : index
    %20 = vector.load %arg6[%c0_10, %c0_11] : memref<16x1xf32, #tpu.memory_space<vmem>>, vector<16x1xf32>
    tpu.vector_store %arg6[%c0_10, %c0_11], %19 {strides = array<i32>} : memref<16x1xf32, #tpu.memory_space<vmem>>, vector<16x1xf32>,
    %c0_12 = arith.constant 0 : index
    %c0_13 = arith.constant 0 : index
    %21 = vector.load %arg5[%c0_12, %c0_13] : memref<16x1xf32, #tpu.memory_space<vmem>>, vector<16x1xf32>
    tpu.vector_store %arg5[%c0_12, %c0_13], %9 {strides = array<i32>} : memref<16x1xf32, #tpu.memory_space<vmem>>, vector<16x1xf32>,
    %c0_i32_14 = arith.constant 0 : i32
    %22 = arith.cmpi eq, %arg1, %c0_i32_14 : i32
    %23 = arith.extui %22 : i1 to i32
    %c0_i32_15 = arith.constant 0 : i32
    %24 = arith.cmpi ne, %23, %c0_i32_15 : i32
    scf.if %24 {
      %c0_16 = arith.constant 0 : index
      %c0_17 = arith.constant 0 : index
      %25 = vector.load %arg5[%c0_16, %c0_17] : memref<16x1xf32, #tpu.memory_space<vmem>>, vector<16x1xf32>
      %c0_18 = arith.constant 0 : index
      %c0_19 = arith.constant 0 : index
      %26 = vector.load %arg6[%c0_18, %c0_19] : memref<16x1xf32, #tpu.memory_space<vmem>>, vector<16x1xf32>
      %27 = math.log %26 : vector<16x1xf32>
      %28 = arith.addf %25, %27 : vector<16x1xf32>
      %c0_20 = arith.constant 0 : index
      %c0_21 = arith.constant 0 : index
      %29 = vector.load %arg4[%c0_20, %c0_21] : memref<16x1xf32, #tpu.memory_space<vmem>>, vector<16x1xf32>
      tpu.vector_store %arg4[%c0_20, %c0_21], %28 {strides = array<i32>} : memref<16x1xf32, #tpu.memory_space<vmem>>, vector<16x1xf32>,
    } else {
    }
    return
  }
  func.func @transform_0(%arg0: i32, %arg1: i32) -> (i32, i32) {
    %c0_i32 = arith.constant 0 : i32
    %c0_i32_0 = arith.constant 0 : i32
    return %arg0, %c0_i32 : i32, i32
  }
  func.func @transform_1(%arg0: i32, %arg1: i32) -> (i32, i32) {
    %c0_i32 = arith.constant 0 : i32
    %c0_i32_0 = arith.constant 0 : i32
    return %arg1, %c0_i32 : i32, i32
  }
  func.func @transform_2(%arg0: i32, %arg1: i32) -> (i32, i32) {
    %c0_i32 = arith.constant 0 : i32
    %c0_i32_0 = arith.constant 0 : i32
    return %arg0, %c0_i32 : i32, i32
  }
}

</mosaic_0001>

<bundles_post_ra>
// kernel: tpu_custom_call.1
= control target key start
LH: loop header
LB: loop body
LE: loop exit
PB: predicated region body
PF: predicated region fallthrough
CT: control target
= control target key end

     0   :  { %7 = vsyncpa [#allocation5], 0  ;;  %s326_s0 = inlined_call_operand.hbm [shape: f32[16,128], index: 0, kind: input, shape index: {}]   ;;  %s327_s1 = inlined_call_operand.hbm [shape: f32[24,128], index: 1, kind: input, shape index: {}]   ;;  %s328_s2 = inlined_call_operand.vmem [shape: f32[16,1], index: 2, kind: output, shape index: {}]  }
   0x1   :  { %8 = vsyncpa [#allocation7], 0  ;;  %s278_s9 = smov [#allocation4]  }
   0x2   :  { %s14_s10 = sshll.u32 %s278_s9, 4  ;;  %s15_s10 = int_to_ptr.vmem [resolvable:$true] %s14_s10 }
   0x3   :  { %s242_s11 = scalar_lea.vmem %s15_s10, 256  ;;  %p247_p1 = scmp.lt.s32.totalorder %s15_s10, %s15_s10 }
   0x4   :  { %p243_p0 = scmp.ne.s32.totalorder %s15_s10, %s242_s11  ;;  %p248_p2 = scmp.lt.s32.totalorder %s242_s11, %s242_s11 }
   0x6   :  { %p249_p3 = por %p248_p2, %p247_p1 }
   0x8   :  { %p250_p4 = pnand %p249_p3, %p243_p0 }
   0xa   :  { %253 = shalt.err (!%p250_p4)
}
   0xb   :  { %s279_s12 = smov 128   ;;  %s280_s13 = smov 8  }
   0xc   :  { %20 = dma.hbm_to_vmem [thread:$0]  %s326_s0, 256, %s15_s10, [#allocation5], %s279_s12, %s279_s12, %s280_s13  }
   0xd   :  { %s281_s16 = smov [#allocation6]  }
   0xe   :  { %s26_s17 = sshll.u32 %s281_s16, 4  ;;  %s27_s17 = int_to_ptr.vmem [resolvable:$true] %s26_s17 }
   0xf   :  { %s262_s18 = scalar_lea.vmem %s27_s17, 384  ;;  %p267_p6 = scmp.lt.s32.totalorder %s27_s17, %s27_s17 }
  0x10   :  { %p263_p5 = scmp.ne.s32.totalorder %s27_s17, %s262_s18  ;;  %p268_p7 = scmp.lt.s32.totalorder %s262_s18, %s262_s18 }
  0x12   :  { %p269_p8 = por %p268_p7, %p267_p6 }
  0x14   :  { %p270_p9 = pnand %p269_p8, %p263_p5 }
  0x16   :  { %273 = shalt.err (!%p270_p9)
}
  0x17   :  { %32 = dma.hbm_to_vmem [thread:$0]  %s327_s1, 384, %s27_s17, [#allocation7], %s279_s12, %s279_s12, %s280_s13  }
  0x18   :  { %274 = dma.done.wait [#allocation5], 256  }
  0x19   :  { %275 = vsyncadd [#allocation5], 4294967040 }
  0x1a   :  { %276 = dma.done.wait [#allocation7], 384  }
  0x1b   :  { %277 = vsyncadd [#allocation7], 4294966912  ;;  %v52_v0 = vld [vmem:[#allocation6 + $0x10] sm:$0xff]  ;;  %v51_v1 = vld [vmem:[#allocation6 + $0x8] sm:$0xff]  ;;  %vm43_vm0 = vcmask 7168   ;;  %v282_v5 = vmov -inf  }
  0x1c   :  { %204 = vmatprep.subr.mxu0 %v52_v0  ;;  %v48_v2 = vld [vmem:[#allocation4] sm:$0xff]  ;;  %v50_v3 = vld [vmem:[#allocation6] sm:$0xff]  ;;  %v49_v4 = vld [vmem:[#allocation4 + $0x8] sm:$0xff]  ;;  %44 = vst.msk [vmem:[#allocation2] sm:$0xff] %vm43_vm0, %v282_v5  ;;  %vm130_vm1 = vcmask 195584   ;;  %v283_v10 = vmov 0  }
  0x1d   :  { %205 = vmatpush3.xpose.msra.mxu0 %v52_v0  ;;  %210 = vmatprep.mubr.f32.mxu0 %v48_v2  ;;  %45 = vst.msk [vmem:[#allocation2 + $0x8] sm:$0xff] %vm43_vm0, %v282_v5  ;;  %v284_v11 = vmov 0.0  }
  0x1e   :  { %206 = vmatprep.subr.mxu0 %v51_v1  ;;  %220 = vset.pattern.permute.xlu1 %v283_v10  ;;  %46 = vst.msk [vmem:[#allocation3] sm:$0xff] %vm43_vm0, %v284_v11  ;;  %47 = vst.msk [vmem:[#allocation3 + $0x8] sm:$0xff] %vm43_vm0, %v284_v11 }
  0x1f   :  { %221 = vset.pattern.permute.xlu0 %v283_v10 }
  0x21   :  { %207 = vmatpush3.xpose.msra.mxu0 %v51_v1 }
  0x22   :  { %208 = vmatprep.subr.mxu0 %v50_v3 }
  0x23   :  { %v128_v12 = vld [vmem:[#allocation2] sm:$0xff] }
  0x24   :  { %v129_v15 = vld [vmem:[#allocation2 + $0x8] sm:$0xff] }
  0x25   :  { %209 = vmatpush3.xpose.msra.mxu0 %v50_v3  ;;  %v145_v33 = vld [vmem:[#allocation3] sm:$0xff]  ;;  %v146_v37 = vld [vmem:[#allocation3 + $0x8] sm:$0xff] }
  0x28   :  { %211 = vmatmul.mubr.f32.vlgmr.msra.gmra.mxu0 %v49_v4 }
  0xe8   :  { %v212_v6 = vpop.f32.mrf.mxu0 }
  0xe9   :  { %v134_v9 = vsel %vm130_vm1, %v212_v6, -inf }
  0xea   :  { %v119_v7 = vpop.f32.mrf.mxu0 }
  0xeb   :  { %v131_v8 = vsel %vm130_vm1, %v119_v7, -inf }
  0xec   :  { %132 = vmax.xlane.f32.xlu0 %v131_v8 }
  0xf0   :  { %135 = vmax.xlane.f32.xlu0 %v134_v9 }
 0x175   :  { %v133_v13 = vpop.xlane.xlu0 %132 }
 0x176   :  { %v137_v14 = vmax.f32 %v128_v12, %v133_v13 }
 0x178   :  { %v139_v16 = vsub.f32 %v128_v12, %v137_v14  ;;  %176 = vst.msk [vmem:[#allocation2] sm:$0xff] %vm43_vm0, %v137_v14  ;;  %151 = vperm.xlu1 %220, %v137_v14  }
 0x179   :  { %v136_v17 = vpop.xlane.xlu0 %135 }
 0x17a   :  { %v138_v18 = vmax.f32 %v129_v15, %v136_v17  ;;  %v141_v30 = vmul.f32 1.442695, %v139_v16 }
 0x17c   :  { %v140_v19 = vsub.f32 %v129_v15, %v138_v18  ;;  %177 = vst.msk [vmem:[#allocation2 + $0x8] sm:$0xff] %vm43_vm0, %v138_v18  ;;  %156 = vperm.xlu1 %220, %v138_v18  }
 0x17e   :  { %v143_v31 = vmul.f32 1.442695, %v140_v19 }
 0x17f   :  { %v181_v46 = vld [vmem:[#allocation2] sm:$0xff] }
 0x183   :  { %v182_v50 = vld [vmem:[#allocation2 + $0x8] sm:$0xff] }
 0x1f3   :  { %v152_v20 = vpop.permute.xlu1 %151 }
 0x1f4   :  { %v159_v21 = vsub.f32 %v119_v7, %v152_v20 }
 0x1f6   :  { %v161_v22 = vmul.f32 1.442695, %v159_v21 }
 0x1f7   :  { %v157_v23 = vpop.permute.xlu1 %156 }
 0x1f8   :  { %222 = vpow2.f32 %v161_v22  ;;  %v160_v24 = vsub.f32 %v212_v6, %v157_v23 }
 0x1fa   :  { %v163_v25 = vmul.f32 1.442695, %v160_v24 }
 0x1fc   :  { %224 = vpow2.f32 %v163_v25 }
 0x1fd   :  { %226 = vpow2.f32 %v141_v30 }
 0x1fe   :  { %228 = vpow2.f32 %v143_v31 }
 0x205   :  { %v223_v26 = vpop.eup %222 }
 0x206   :  { %v165_v27 = vsel %vm130_vm1, %v223_v26, 0.0 }
 0x207   :  { %166 = vadd.xlane.f32.xlu0 %v165_v27 }
 0x209   :  { %v225_v28 = vpop.eup %224 }
 0x20a   :  { %v168_v29 = vsel %vm130_vm1, %v225_v28, 0.0  ;;  %v227_v32 = vpop.eup %226 }
 0x20b   :  { %169 = vadd.xlane.f32.xlu1 %v168_v29  ;;  %v147_v34 = vmul.f32 %v227_v32, %v145_v33  ;;  %v229_v35 = vpop.eup %228 }
 0x20c   :  { %v148_v39 = vmul.f32 %v229_v35, %v146_v37 }
 0x290   :  { %v167_v36 = vpop.xlane.xlu0 %166 }
 0x291   :  { %v171_v38 = vadd.f32 %v167_v36, %v147_v34 }
 0x293   :  { %174 = vst.msk [vmem:[#allocation3] sm:$0xff] %vm43_vm0, %v171_v38 }
 0x294   :  { %v170_v40 = vpop.xlane.xlu1 %169 }
 0x295   :  { %v172_v41 = vadd.f32 %v170_v40, %v148_v39 }
 0x297   :  { %175 = vst.msk [vmem:[#allocation3 + $0x8] sm:$0xff] %vm43_vm0, %v172_v41 }
 0x29a   :  { %v183_v42 = vld [vmem:[#allocation3] sm:$0xff] }
 0x29b   :  { %230 = vlog2.f32 %v183_v42 }
 0x29e   :  { %v184_v43 = vld [vmem:[#allocation3 + $0x8] sm:$0xff] }
 0x29f   :  { %232 = vlog2.f32 %v184_v43 }
 0x2a8   :  { %v231_v44 = vpop.eup %230 }
 0x2a9   :  { %v186_v45 = vmul.f32 0.6931472, %v231_v44 }
 0x2ab   :  { %v189_v47 = vadd.f32 %v186_v45, %v181_v46 }
 0x2ac   :  { %v233_v48 = vpop.eup %232 }
 0x2ad   :  { %191 = vst.msk [vmem:[%s328_s2] sm:$0xff] %vm43_vm0, %v189_v47  ;;  %v188_v49 = vmul.f32 0.6931472, %v233_v48 }
 0x2af   :  { %v190_v51 = vadd.f32 %v188_v49, %v182_v50 }
 0x2b1   :  { %192 = vst.msk [vmem:[%s328_s2 + $0x8] sm:$0xff] %vm43_vm0, %v190_v51 }
 0x2b2   :  { %197 = vsyncpa [#allocation5], 1 }
 0x2b3   :  { %198 = vsyncpa [#allocation7], 1 }

</bundles_post_ra>
